<compile_context>
chip_gen: v5e
topology: v5e:2x2
jax: 0.10.0
libtpu: 0.0.40
codegen_flags: <defaults>
</compile_context>

<pallas_src>
import jax
import jax.numpy as jnp
from jax.experimental import pallas as pl
from jax.experimental.pallas import tpu as pltpu

_LANES = 512          # lane-dense last dim (multiple of 128)
_MAX_BLOCK_ROWS = 512  # 512 x 512 f32 = 1 MiB per tile


def _copy_kernel(x_ref, o_ref):
    # Identity: o = x (one lane-dense tile per grid step).
    o_ref[...] = x_ref[...]


def loss_forward(x):
    """Loss.forward (identity). No kernel launch — the op is semantically free."""
    return x


def loss_forward_copy(x):
    """Identity that materializes a fresh output buffer via a Pallas copy kernel."""
    orig_shape = x.shape
    orig_dtype = x.dtype

    n = x.size
    if n == 0 or x.ndim == 0:
        # Nothing to copy / scalar: fall back to the trivial path.
        return x

    flat = x.reshape(-1)

    # Lane-dense 2-D view: rows of _LANES elements, padded as needed.
    rows = pl.cdiv(n, _LANES)
    if rows <= _MAX_BLOCK_ROWS:
        block_rows = rows                       # single row-block == full dim
    else:
        block_rows = _MAX_BLOCK_ROWS
        rows = pl.cdiv(rows, block_rows) * block_rows

    padded = rows * _LANES
    if padded != n:
        flat = jnp.pad(flat, (0, padded - n))
    x2d = flat.reshape(rows, _LANES)

    grid = (rows // block_rows,)

    out = pl.pallas_call(
        _copy_kernel,
        out_shape=jax.ShapeDtypeStruct((rows, _LANES), orig_dtype),
        grid=grid,
        in_specs=[pl.BlockSpec((block_rows, _LANES), lambda i: (i, 0))],
        out_specs=pl.BlockSpec((block_rows, _LANES), lambda i: (i, 0)),
        compiler_params=pltpu.CompilerParams(
            dimension_semantics=("parallel",),
        ),
    )(x2d)

    return out.reshape(-1)[:n].reshape(orig_shape)


if __name__ == "__main__":
    key = jax.random.PRNGKey(0)
    # Small NCHW input consistent with a typical loss-module call.
    x = jax.random.normal(key, (2, 4, 16, 16), dtype=jnp.float32)

    # Primary path: identity with zero data movement.
    y_fast = loss_forward(x)
    jax.block_until_ready(y_fast)
    assert y_fast.shape == x.shape and y_fast.dtype == x.dtype
    assert bool(jnp.allclose(y_fast, x)), "identity (no-op path) mismatch"

    # Materialized path: optimized Pallas copy kernel.
    y_copy = loss_forward_copy(x)
    jax.block_until_ready(y_copy)
    assert y_copy.shape == x.shape and y_copy.dtype == x.dtype
    assert bool(jnp.allclose(y_copy, x)), "identity (copy kernel) mismatch"

    print("KERNEL_OK")
</pallas_src>

<mosaic_0001>
module attributes {stable_mosaic.version = 11 : i64} {
  func.func @_copy_kernel(%arg0: i32, %arg1: memref<4x512xf32, #tpu.memory_space<vmem>>, %arg2: memref<4x512xf32, #tpu.memory_space<vmem>>) attributes {dimension_semantics = [#tpu.dimension_semantics<parallel>], iteration_bounds = array<i64: 1>, scalar_prefetch = 0 : i64, scratch_operands = 0 : i64, tpu.core_type = #tpu.core_type<tc>, window_params = [{transform_indices = @transform_0, window_bounds = array<i64: 4, 512>}, {transform_indices = @transform_1, window_bounds = array<i64: 4, 512>}]} {
    %c0 = arith.constant 0 : index
    %c0_0 = arith.constant 0 : index
    %0 = vector.load %arg1[%c0, %c0_0] : memref<4x512xf32, #tpu.memory_space<vmem>>, vector<4x512xf32>
    %c0_1 = arith.constant 0 : index
    %c0_2 = arith.constant 0 : index
    %1 = vector.load %arg2[%c0_1, %c0_2] : memref<4x512xf32, #tpu.memory_space<vmem>>, vector<4x512xf32>
    tpu.vector_store %arg2[%c0_1, %c0_2], %0 {strides = array<i32>} : memref<4x512xf32, #tpu.memory_space<vmem>>, vector<4x512xf32>,
    return
  }
  func.func @transform_0(%arg0: i32) -> (i32, i32) {
    %c0_i32 = arith.constant 0 : i32
    %c0_i32_0 = arith.constant 0 : i32
    return %arg0, %c0_i32 : i32, i32
  }
  func.func @transform_1(%arg0: i32) -> (i32, i32) {
    %c0_i32 = arith.constant 0 : i32
    %c0_i32_0 = arith.constant 0 : i32
    return %arg0, %c0_i32 : i32, i32
  }
}

</mosaic_0001>

<bundles_post_ra>
// kernel: tpu_custom_call.1
= control target key start
LH: loop header
LB: loop body
LE: loop exit
PB: predicated region body
PF: predicated region fallthrough
CT: control target
= control target key end

     0   :  { %6 = vsyncpa [#allocation3], 0  ;;  %s116_s0 = inlined_call_operand.hbm [shape: f32[4,512], index: 0, kind: input, shape index: {}]   ;;  %s117_s1 = inlined_call_operand.hbm [shape: f32[4,512], index: 1, kind: output, shape index: {}]  }
   0x1   :  { %7 = vsyncpa [#allocation4], 0  ;;  %s13_s8 = sshll.u32 %s116_s0, 4  ;;  %s98_s9 = smov [#allocation2]   ;;  %s14_s8 = int_to_ptr.hbm [resolvable:$true] %s13_s8 }
   0x2   :  { %s15_s10 = sshll.u32 %s98_s9, 4  ;;  %s16_s10 = int_to_ptr.vmem [resolvable:$true] %s15_s10 }
   0x3   :  { %18 = dma.hbm_to_vmem [thread:$0]  %s14_s8, 256, %s16_s10, [#allocation3]  }
   0x4   :  { %94 = dma.done.wait [#allocation3], 256  }
   0x5   :  { %95 = vsyncadd [#allocation3], 4294967040  ;;  %s99_s11 = smov [#allocation5]   ;;  %s34_s15 = sshll.u32 %s117_s1, 4  ;;  %v23_v0 = vld [vmem:[#allocation2] sm:$0xff]  ;;  %v24_v1 = vld [vmem:[#allocation2 + $0x8] sm:$0xff]  ;;  %s35_s15 = int_to_ptr.hbm [resolvable:$true] %s34_s15 }
   0x6   :  { %s32_s12 = sshll.u32 %s99_s11, 4  ;;  %25 = vst [vmem:[#allocation5] sm:$0xff] %v23_v0  ;;  %s33_s12 = int_to_ptr.vmem [resolvable:$true] %s32_s12 }
   0x7   :  { %26 = vst [vmem:[#allocation5 + $0x8] sm:$0xff] %v24_v1 }
   0x8   :  { %37 = dma.vmem_to_hbm [thread:$0]  %s33_s12, 256, %s35_s15, [#allocation4]  }
   0x9   :  { %96 = dma.done.wait [#allocation4], 256  }
   0xa   :  { %97 = vsyncadd [#allocation4], 4294967040 }
   0xb   :  { %42 = vsyncpa [#allocation3], 1 }
   0xc   :  { %43 = vsyncpa [#allocation4], 1 }

</bundles_post_ra>
